<compile_context>
chip_gen: v7x
topology: tpu7x:2x2x1
jax: 0.10.0
libtpu: 0.0.40
codegen_flags: <defaults>
</compile_context>

<pallas_src>
import functools

import jax
import jax.numpy as jnp
from jax import lax
from jax.experimental import pallas as pl
from jax.experimental.pallas import tpu as pltpu

_LANE = 128
_SLAB_BYTES_BUDGET = 6 * 1024 * 1024     # per-step input-slab cap (v7x-safe)
_MIN_SLAB_BYTES = 1 * 1024 * 1024        # don't shrink slabs below ~1 MiB just for steps
_TARGET_STEPS = 8                        # >= 4 grid steps per v7x TensorCore
_VMEM_LIMIT_BYTES = 40 * 1024 * 1024     # steady state ~<= 28 MiB; headroom on v7x's 64 MiB


# ---------------------------------------------------------------------------
# Single-pass kernel: whole (bt, C, HW) slab resident per grid step.
# ---------------------------------------------------------------------------
def _se_kernel(x_ref, w1_ref, w2_ref, o_ref, *, inv_hw):
    # Global average pool in f32.  The cast fuses into the reduction, so no
    # f32 copy of the slab stays live (matters for bf16 inputs / VMEM).
    pooled = jnp.sum(x_ref[...].astype(jnp.float32), axis=2) * inv_hw      # (bt, C)
    # fc1 / fc2 are bias-free 1x1 convs == channel matmuls, batched over bt.
    h = lax.dot_general(pooled, w1_ref[...],
                        dimension_numbers=(((1,), (1,)), ((), ())),
                        preferred_element_type=jnp.float32)                # (bt, Cr)
    h = jnp.maximum(h, 0.0)                                                # ReLU
    s = lax.dot_general(h, w2_ref[...],
                        dimension_numbers=(((1,), (1,)), ((), ())),
                        preferred_element_type=jnp.float32)                # (bt, C)
    s = jax.nn.sigmoid(s)                                                  # Sigmoid
    # Channel-wise rescale, broadcast over the lane-mapped spatial axis.
    o_ref[...] = (x_ref[...] * s[:, :, None].astype(x_ref.dtype)).astype(o_ref.dtype)


def _choose_batch_tile(B, C, HW, elt_bytes):
    """Batch tile: slab fits the VMEM budget, >= _TARGET_STEPS grid steps when
    possible (keeping slabs >= ~1 MiB), >= 2 steps and an even step count so
    both v7x TensorCores get equal work."""
    per_b = max(1, C * HW * elt_bytes)
    bt_cap = max(1, _SLAB_BYTES_BUDGET // per_b)           # slab must fit the budget
    bt_steps = pl.cdiv(B, _TARGET_STEPS)                   # enough steps to pipeline
    bt_slab = max(1, _MIN_SLAB_BYTES // per_b)             # but keep slabs >= ~1 MiB
    bt = min(B, bt_cap, max(bt_steps, bt_slab))
    if B >= 2:
        bt = min(bt, max(1, B // 2))                       # >= 2 steps: both v7x cores busy
    steps = pl.cdiv(B, bt)
    # Prefer an even number of grid steps (balanced megacore sharding).
    if steps > 1 and steps % 2 == 1 and bt > 1:
        bt2 = max(1, pl.cdiv(B, steps + 1))
        if pl.cdiv(B, bt2) % 2 == 0:
            bt = bt2
    return bt


def _se_single_pass(x_flat, w1, w2, *, hw):
    B, C, HW = x_flat.shape
    Cr = w1.shape[0]
    elt = jnp.dtype(x_flat.dtype).itemsize
    bt = _choose_batch_tile(B, C, HW, elt)
    grid = (pl.cdiv(B, bt),)                               # non-divisor bt ok: tail masked on store

    kernel = functools.partial(_se_kernel, inv_hw=float(1.0 / hw))
    cost = pl.CostEstimate(
        flops=4 * B * C * Cr + 2 * B * C * HW,
        transcendentals=B * C,
        bytes_accessed=2 * B * C * HW * elt + 2 * C * Cr * jnp.dtype(w1.dtype).itemsize,
    )
    return pl.pallas_call(
        kernel,
        out_shape=jax.ShapeDtypeStruct((B, C, HW), x_flat.dtype),
        grid_spec=pltpu.PrefetchScalarGridSpec(
            num_scalar_prefetch=0,
            grid=grid,
            in_specs=[
                pl.BlockSpec((bt, C, HW), lambda b: (b, 0, 0)),   # x slab (full C, HW dims)
                pl.BlockSpec((Cr, C), lambda b: (0, 0)),          # fc1 weight, resident
                pl.BlockSpec((C, Cr), lambda b: (0, 0)),          # fc2 weight, resident
            ],
            out_specs=pl.BlockSpec((bt, C, HW), lambda b: (b, 0, 0)),
        ),
        compiler_params=pltpu.CompilerParams(
            dimension_semantics=("parallel",),
            vmem_limit_bytes=_VMEM_LIMIT_BYTES,
        ),
        cost_estimate=cost,
    )(x_flat, w1, w2)


# ---------------------------------------------------------------------------
# Two-pass fallback: pooled/FC pass then rescale pass, spatially tiled.
# ---------------------------------------------------------------------------
def _pool_fc_kernel(x_ref, w1_ref, w2_ref, s_ref, acc_ref, *, hw, inv_hw):
    si = pl.program_id(1)

    @pl.when(si == 0)
    def _init():
        acc_ref[...] = jnp.zeros_like(acc_ref)

    x = x_ref[...].astype(jnp.float32)                     # (1, C, hwt)
    hwt = x.shape[-1]
    lane = lax.broadcasted_iota(jnp.int32, (1, 1, hwt), 2)
    valid = (si * hwt + lane) < hw                         # mask garbage in the spatial tail
    acc_ref[...] += jnp.sum(jnp.where(valid, x, 0.0), axis=2)

    @pl.when(si == pl.num_programs(1) - 1)
    def _finalize():
        pooled = acc_ref[...] * inv_hw                     # (1, C)
        h = lax.dot_general(pooled, w1_ref[...],
                            dimension_numbers=(((1,), (1,)), ((), ())),
                            preferred_element_type=jnp.float32)
        h = jnp.maximum(h, 0.0)
        sc = lax.dot_general(h, w2_ref[...],
                             dimension_numbers=(((1,), (1,)), ((), ())),
                             preferred_element_type=jnp.float32)
        s_ref[...] = jax.nn.sigmoid(sc)


def _rescale_kernel(s_ref, x_ref, o_ref):
    s = s_ref[...]                                         # (1, C) f32
    o_ref[...] = (x_ref[...] * s[:, :, None].astype(x_ref.dtype)).astype(o_ref.dtype)


def _choose_spatial_tile(C, HW, elt_bytes):
    hwt = (_SLAB_BYTES_BUDGET // max(1, C * elt_bytes)) // _LANE * _LANE
    hwt = max(_LANE, hwt)
    return HW if hwt >= HW else hwt                        # < HW => multiple of 128 (legal)


def _se_two_pass(x_flat, w1, w2, *, hw, hwt=None):
    B, C, HW = x_flat.shape
    Cr = w1.shape[0]
    elt = jnp.dtype(x_flat.dtype).itemsize
    if hwt is None:
        hwt = _choose_spatial_tile(C, HW, elt)
    ns = pl.cdiv(HW, hwt)

    pool_kernel = functools.partial(_pool_fc_kernel, hw=hw, inv_hw=float(1.0 / hw))
    s = pl.pallas_call(
        pool_kernel,
        out_shape=jax.ShapeDtypeStruct((B, C), jnp.float32),
        grid_spec=pltpu.PrefetchScalarGridSpec(
            num_scalar_prefetch=0,
            grid=(B, ns),
            in_specs=[
                pl.BlockSpec((1, C, hwt), lambda b, si: (b, 0, si)),
                pl.BlockSpec((Cr, C), lambda b, si: (0, 0)),
                pl.BlockSpec((C, Cr), lambda b, si: (0, 0)),
            ],
            out_specs=pl.BlockSpec((1, C), lambda b, si: (b, 0)),
            scratch_shapes=[pltpu.VMEM((1, C), jnp.float32)],
        ),
        compiler_params=pltpu.CompilerParams(
            dimension_semantics=("parallel", "arbitrary"),
            vmem_limit_bytes=_VMEM_LIMIT_BYTES,
        ),
        cost_estimate=pl.CostEstimate(
            flops=B * C * HW + 4 * B * C * Cr,
            transcendentals=B * C,
            bytes_accessed=B * C * HW * elt + B * C * 4,
        ),
    )(x_flat, w1, w2)

    return pl.pallas_call(
        _rescale_kernel,
        out_shape=jax.ShapeDtypeStruct((B, C, HW), x_flat.dtype),
        grid_spec=pltpu.PrefetchScalarGridSpec(
            num_scalar_prefetch=0,
            grid=(B, ns),
            in_specs=[
                pl.BlockSpec((1, C), lambda b, si: (b, 0)),
                pl.BlockSpec((1, C, hwt), lambda b, si: (b, 0, si)),
            ],
            out_specs=pl.BlockSpec((1, C, hwt), lambda b, si: (b, 0, si)),
        ),
        compiler_params=pltpu.CompilerParams(
            dimension_semantics=("parallel", "parallel"),
            vmem_limit_bytes=_VMEM_LIMIT_BYTES,
        ),
        cost_estimate=pl.CostEstimate(
            flops=B * C * HW,
            transcendentals=0,
            bytes_accessed=2 * B * C * HW * elt + B * C * 4,
        ),
    )(s, x_flat)


# ---------------------------------------------------------------------------
# Public entry point + pure-JAX reference.
# ---------------------------------------------------------------------------
def se_block(x, w1, w2):
    """x: (B, C, H, W); w1: (C//r, C); w2: (C, C//r). Matches SEBlock.forward."""
    B, C, H, W = x.shape
    HW = H * W
    x_flat = x.reshape(B, C, HW)
    elt = jnp.dtype(x.dtype).itemsize
    if C * HW * elt <= _SLAB_BYTES_BUDGET:
        out_flat = _se_single_pass(x_flat, w1, w2, hw=HW)
    else:
        out_flat = _se_two_pass(x_flat, w1, w2, hw=HW)
    return out_flat.reshape(B, C, H, W)


def se_block_ref(x, w1, w2):
    """Pure-JAX reference mirroring the PyTorch forward."""
    y = jnp.mean(x, axis=(2, 3), keepdims=True)            # AdaptiveAvgPool2d(1)
    y = jnp.einsum("oc,bcij->boij", w1, y)                  # fc1 (1x1 conv, no bias)
    y = jnp.maximum(y, 0.0)                                 # ReLU
    y = jnp.einsum("oc,bcij->boij", w2, y)                  # fc2 (1x1 conv, no bias)
    y = jax.nn.sigmoid(y)                                   # Sigmoid
    return x * y


if __name__ == "__main__":
    B, C, reduction = 2, 32, 16
    Cr = C // reduction

    key = jax.random.PRNGKey(0)
    kx, kx2, kw1, kw2 = jax.random.split(key, 4)
    w1 = jax.random.normal(kw1, (Cr, C), dtype=jnp.float32) * 0.1
    w2 = jax.random.normal(kw2, (C, Cr), dtype=jnp.float32) * 0.1

    # Main check: 16x16 spatial (single-pass path).
    x = jax.random.normal(kx, (B, C, 16, 16), dtype=jnp.float32)
    out = jax.block_until_ready(se_block(x, w1, w2))
    ref = jax.block_until_ready(se_block_ref(x, w1, w2))
    assert out.shape == x.shape
    assert jnp.allclose(out, ref, atol=1e-5, rtol=1e-5)

    # Non-128-multiple spatial size: no wrapper-side pad / slice.
    x2 = jax.random.normal(kx2, (B, C, 15, 15), dtype=jnp.float32)
    out2 = jax.block_until_ready(se_block(x2, w1, w2))
    ref2 = jax.block_until_ready(se_block_ref(x2, w1, w2))
    assert jnp.allclose(out2, ref2, atol=1e-5, rtol=1e-5)

    # Exercise the two-pass fallback (spatial tiling + masked tail) on the same data.
    out3 = jax.block_until_ready(
        _se_two_pass(x2.reshape(B, C, 15 * 15), w1, w2, hw=15 * 15, hwt=128)
    ).reshape(B, C, 15, 15)
    assert jnp.allclose(out3, ref2, atol=1e-5, rtol=1e-5)

    print("KERNEL_OK")
</pallas_src>

<mosaic_0001>
module attributes {stable_mosaic.version = 11 : i64} {
  func.func @_se_kernel(%arg0: i32, %arg1: memref<1x32x256xf32, #tpu.memory_space<vmem>>, %arg2: memref<2x32xf32, #tpu.memory_space<vmem>>, %arg3: memref<32x2xf32, #tpu.memory_space<vmem>>, %arg4: memref<1x32x256xf32, #tpu.memory_space<vmem>>) attributes {dimension_semantics = [#tpu.dimension_semantics<parallel>], iteration_bounds = array<i64: 2>, scalar_prefetch = 0 : i64, scratch_operands = 0 : i64, tpu.core_type = #tpu.core_type<tc>, window_params = [{transform_indices = @transform_0, window_bounds = array<i64: 1, 32, 256>}, {pipeline_mode = #tpu.pipeline_mode<synchronous>, transform_indices = @transform_1, window_bounds = array<i64: 2, 32>}, {pipeline_mode = #tpu.pipeline_mode<synchronous>, transform_indices = @transform_2, window_bounds = array<i64: 32, 2>}, {transform_indices = @transform_3, window_bounds = array<i64: 1, 32, 256>}]} {
    %c0 = arith.constant 0 : index
    %c0_0 = arith.constant 0 : index
    %c0_1 = arith.constant 0 : index
    %0 = vector.load %arg1[%c0, %c0_0, %c0_1] : memref<1x32x256xf32, #tpu.memory_space<vmem>>, vector<1x32x256xf32>
    %cst = arith.constant dense<0.000000e+00> : vector<1x32xf32>
    %1 = vector.multi_reduction <add>, %0, %cst [2] : vector<1x32x256xf32> to vector<1x32xf32>
    %cst_2 = arith.constant 3.906250e-03 : f32
    %2 = vector.broadcast %cst_2 : f32 to vector<1x32xf32>
    %3 = arith.mulf %1, %2 : vector<1x32xf32>
    %c0_3 = arith.constant 0 : index
    %c0_4 = arith.constant 0 : index
    %4 = vector.load %arg2[%c0_3, %c0_4] : memref<2x32xf32, #tpu.memory_space<vmem>>, vector<2x32xf32>
    %cst_5 = arith.constant dense<0.000000e+00> : vector<1x2xf32>
    %5 = tpu.matmul %3, %4, %cst_5 {dimension_numbers = #tpu.dot_dimension_numbers<[1], [1], [0], [0], [0, 0, 1, 0], [], []>} : vector<1x32xf32>, vector<2x32xf32>, vector<1x2xf32> -> vector<1x2xf32>
    %cst_6 = arith.constant 0.000000e+00 : f32
    %6 = vector.broadcast %cst_6 : f32 to vector<1x2xf32>
    %7 = arith.maximumf %5, %6 : vector<1x2xf32>
    %c0_7 = arith.constant 0 : index
    %c0_8 = arith.constant 0 : index
    %8 = vector.load %arg3[%c0_7, %c0_8] : memref<32x2xf32, #tpu.memory_space<vmem>>, vector<32x2xf32>
    %cst_9 = arith.constant dense<0.000000e+00> : vector<1x32xf32>
    %9 = tpu.matmul %7, %8, %cst_9 {dimension_numbers = #tpu.dot_dimension_numbers<[1], [1], [0], [0], [0, 0, 1, 0], [], []>} : vector<1x2xf32>, vector<32x2xf32>, vector<1x32xf32> -> vector<1x32xf32>
    %10 = arith.negf %9 : vector<1x32xf32>
    %11 = math.exp %10 : vector<1x32xf32>
    %cst_10 = arith.constant 1.000000e+00 : f32
    %12 = vector.broadcast %cst_10 : f32 to vector<1x32xf32>
    %13 = arith.addf %12, %11 : vector<1x32xf32>
    %14 = arith.divf %12, %13 : vector<1x32xf32>
    %c0_11 = arith.constant 0 : index
    %c0_12 = arith.constant 0 : index
    %c0_13 = arith.constant 0 : index
    %15 = vector.load %arg1[%c0_11, %c0_12, %c0_13] : memref<1x32x256xf32, #tpu.memory_space<vmem>>, vector<1x32x256xf32>
    %16 = vector.shape_cast %14 : vector<1x32xf32> to vector<1x32x1xf32>
    %17 = vector.broadcast %16 : vector<1x32x1xf32> to vector<1x32x256xf32>
    %18 = arith.mulf %15, %17 : vector<1x32x256xf32>
    %c0_14 = arith.constant 0 : index
    %c0_15 = arith.constant 0 : index
    %c0_16 = arith.constant 0 : index
    %19 = vector.load %arg4[%c0_14, %c0_15, %c0_16] : memref<1x32x256xf32, #tpu.memory_space<vmem>>, vector<1x32x256xf32>
    tpu.vector_store %arg4[%c0_14, %c0_15, %c0_16], %18 {strides = array<i32>} : memref<1x32x256xf32, #tpu.memory_space<vmem>>, vector<1x32x256xf32>,
    return
  }
  func.func @transform_0(%arg0: i32) -> (i32, i32, i32) {
    %c0_i32 = arith.constant 0 : i32
    %c0_i32_0 = arith.constant 0 : i32
    %c0_i32_1 = arith.constant 0 : i32
    return %arg0, %c0_i32, %c0_i32_0 : i32, i32, i32
  }
  func.func @transform_1(%arg0: i32) -> (i32, i32) {
    %c0_i32 = arith.constant 0 : i32
    %c0_i32_0 = arith.constant 0 : i32
    %c0_i32_1 = arith.constant 0 : i32
    return %c0_i32, %c0_i32_0 : i32, i32
  }
  func.func @transform_2(%arg0: i32) -> (i32, i32) {
    %c0_i32 = arith.constant 0 : i32
    %c0_i32_0 = arith.constant 0 : i32
    %c0_i32_1 = arith.constant 0 : i32
    return %c0_i32, %c0_i32_0 : i32, i32
  }
  func.func @transform_3(%arg0: i32) -> (i32, i32, i32) {
    %c0_i32 = arith.constant 0 : i32
    %c0_i32_0 = arith.constant 0 : i32
    %c0_i32_1 = arith.constant 0 : i32
    return %arg0, %c0_i32, %c0_i32_0 : i32, i32, i32
  }
}

</mosaic_0001>

<bundles_post_ra>
// kernel: tpu_custom_call.1
= control target key start
LH: loop header
LB: loop body
LE: loop exit
PB: predicated region body
PF: predicated region fallthrough
CT: control target
= control target key end

     0   :  { %8 = vsyncpa [#allocation3], 0  ;;  %s997_s0 = inlined_call_operand.hbm [shape: f32[2,32,256], index: 0, kind: input, shape index: {}]   ;;  %s998_s1 = inlined_call_operand.vmem [shape: f32[2,32], index: 1, kind: input, shape index: {}]   ;;  %s999_s2 = inlined_call_operand.vmem [shape: f32[32,2], index: 2, kind: input, shape index: {}]   ;;  %s1000_s3 = inlined_call_operand.hbm [shape: f32[2,32,256], index: 3, kind: output, shape index: {}]  }
   0x1   :  { %10 = vsyncpa [#allocation3 + $0x1], 0 }
   0x2   :  { %11 = vsyncpa [#allocation4], 0 }
   0x3   :  { %13 = vsyncpa [#allocation4 + $0x1], 0  ;;  %s779_s12 = smov 0   ;;  %s781_s13 = smov 0  }
   0x4   :  { %s783_s14 = smov 0   ;;  %s785_s15 = smov 0  }
   0x5 LB: > { %s800_s16 = sadd.s32 4294967295, %s748_s15   ;;  %s540_s17 = sadd.s32 4294967294, %s748_s15   ;;  %s748_s15 = sphi %s785_s15, %s1013_s15   ;;  %s744_s14 = sphi %s783_s14, %s1012_s14   ;;  %s740_s13 = sphi %s781_s13, %s1011_s13   ;;  %s736_s12 = sphi %s779_s12, %s1010_s12  }
   0x6   : > { %s804_s18 = sadd.s32 1, %s748_s15   ;;  %s26_s19 = sadd.s32 1, %s744_s14 }
   0x7   : > { %s23_s20 = ssub.s32 %s748_s15, %s804_s18  ;;  %p33_p0 = scmp.ne.s32.totalorder %s744_s14, %s740_s13 }
   0x8   : > { %p24_p1 = scmp.eq.s32.totalorder %s23_s20, 0  ;;  %p34_p2 = scmp.eq.s32.totalorder %s748_s15, 0 }
   0x9   : > { %p39_p3 = scmp.ne.s32.totalorder %s740_s13, %s736_s12  ;;  %p40_p4 = scmp.eq.s32.totalorder %s800_s16, 0 }
   0xa   : > { %s816_s21 = scalar_select %p24_p1, %s744_s14, %s26_s19  }
   0xb   : > { %p818_p5 = por %p34_p2, %p33_p0  ;;  %p822_p6 = por %p40_p4, %p39_p3 }
   0xc   : > { %p105_p7 = scmp.eq.s32.totalorder %s800_s16, 1  ;;  %p111_p8 = scmp.eq.s32.totalorder %s540_s17, 1 }
   0xd   : > { %p607_p10 = scmp.lt.s32.totalorder %s748_s15, 2  ;;  %s137_s26 = sand.u32 1, %s744_s14  }
   0xe   : > { %p829_p11 = por %p105_p7, %p33_p0  ;;  %p833_p12 = por %p111_p8, %p39_p3 }
   0xf   : > { %s562_s27 = sshll.u32 %s748_s15, 10  ;;  %s543_s28 = sshll.u32 %s137_s26, 6 }
  0x10   : > { %s1004_s24 = scalar_select %p829_p11, 1, 0 }
  0x11   : > { %s1005_s25 = scalar_select %p833_p12, 1, 0 }
  0x12   : > { %s842_s4 = scalar_lea.hbm %s997_s0, %s562_s27  ;;  %s141_s5 = scalar_lea.vmem [#allocation2], %s543_s28 }
  0x13   : > { %s148_s6 = sshll.u32 %s141_s5, 4  ;;  %p846_p13 = pnand %p607_p10, %p818_p5  ;;  %s850_s6 = int_to_ptr.vmem [resolvable:$true] %s148_s6 }
  0x14   : > { %s852_s8 = scalar_lea.sflag [#allocation3], %s137_s26  ;;  %s652_s9 = scalar_lea.hbm %s842_s4, 1024 }
  0x15   : > { %p653_p0 = scmp.ne.s32.totalorder %s842_s4, %s652_s9  ;;  %p654_p1 = pneg %p846_p13 }
  0x16   : > { %s657_s17 = scalar_lea.hbm %s997_s0, 2048  ;;  %p658_p4 = scmp.lt.u32.totalorder %s842_s4, %s997_s0 }
  0x17   : > { %p655_p2 = pnand %p654_p1, %p653_p0  ;;  %p659_p5 = scmp.lt.u32.totalorder %s657_s17, %s652_s9 }
  0x18   : > { %p661_p8 = scmp.lt.u32.totalorder %s652_s9, %s842_s4 }
  0x19   : > { %p656_p3 = pneg %p655_p2  ;;  %p660_p7 = por %p659_p5, %p658_p4 }
  0x1b   : > { %p662_p10 = por %p661_p8, %p660_p7 }
  0x1d   : > { %p663_p9 = pnand %p662_p10, %p656_p3 }
  0x1f   : > { %666 = shalt.err (!%p663_p9)
}
  0x20   : > { %s667_s22 = scalar_lea.vmem %s850_s6, 1024  ;;  %s750_s26 = smov [#allocation2]  }
  0x21   : > { %p668_p0 = scmp.ne.s32.totalorder %s850_s6, %s667_s22  ;;  %s672_s27 = sshll.u32 %s750_s26, 4  ;;  %s673_s27 = int_to_ptr.vmem [resolvable:$false] %s672_s27 }
  0x22   : > { %s674_s28 = scalar_lea.vmem %s673_s27, 2048  ;;  %p675_p11 = scmp.lt.s32.totalorder %s850_s6, %s673_s27 }
  0x23   : > { %p670_p2 = pnand %p668_p0, %p654_p1  ;;  %p676_p4 = scmp.lt.s32.totalorder %s674_s28, %s667_s22 }
  0x25   : > { %p671_p12 = pneg %p670_p2  ;;  %p677_p5 = por %p676_p4, %p675_p11 }
  0x27   : > { %p678_p7 = pnand %p677_p5, %p671_p12 }
  0x29   : > { %681 = shalt.err (!%p678_p7)
}
  0x2a   : > { %s751_s29 = smov 256   ;;  %s752_s30 = smov 16  }
  0x2b   : > { %602 = dma.hbm_to_vmem [thread:$0]  (!%p846_p13), %s842_s4, 1024, %s850_s6, %s852_s8, %s751_s29, %s751_s29, %s752_s30  }
  0x2c   : > { %p546_p9 = scmp.ge.s32.totalorder %s748_s15, 1  ;;  %p156_p1 = scmp.lt.s32.totalorder %s748_s15, 3 }
  0x2e   : > { %p157_p3 = pnand %p546_p9, %p156_p1 }
  0x2f   : > { %s883_s5 = sand.u32 (!%p157_p3), 1, %s740_s13  }
  0x30   : > { %160 = sbr.rel (%p157_p3) target bundleno = 806 (0x326), region = 32  ;;  %s547_s9 = sshll.u32 (!%p157_p3), %s883_s5, 6 }
  0x31   : > { %s163_s10 = scalar_lea.sflag (!%p157_p3), [#allocation3], %s883_s5  ;;  %s166_s11 = scalar_lea.vmem (!%p157_p3), [#allocation2], %s547_s9 }
  0x37   : > { %727 = dma.done.wait (%p822_p6), %s163_s10, 1024  }
  0x38   : > { %729 = vsyncadd (%p822_p6), %s163_s10, 4294966272  ;;  %v893_v0 = vld [vmem:[%s166_s11] sm:$0xff]  ;;  %v895_v1 = vld [vmem:[%s166_s11 + $0x8] sm:$0xff]  ;;  %v753_v12 = vmov 0.0   ;;  %vm245_vm0 = vcmask 261120   ;;  %vm754_vm1 = vmmov 0   ;;  %v218_v21 = vlaneseq }
  0x39   : > { %v897_v2 = vld [vmem:[%s166_s11 + $0x20] sm:$0xff]  ;;  %v197_v3 = vadd.f32 %v895_v1, %v893_v0  ;;  %v901_v4 = vld [vmem:[%s166_s11 + $0x28] sm:$0xff]  ;;  %v903_v5 = vld [vmem:[%s166_s11 + $0x10] sm:$0xff]  ;;  %571 = vmatprep.subr.mxu0 %v753_v12  ;;  %573 = vmatprep.mubr.msk.f32.mxu0 %vm754_vm1, %v753_v12  ;;  %vm326_vm2 = vcmask 15360   ;;  %v755_v16 = vmov 0.0|0.0   ;;  %vm229_vm4 = vcmask 130112  }
  0x3a   : > { %v905_v6 = vld [vmem:[%s166_s11 + $0x18] sm:$0xff]  ;;  %v203_v7 = vadd.f32 %v901_v4, %v897_v2  ;;  %v909_v8 = vld [vmem:[%s166_s11 + $0x30] sm:$0xff]  ;;  %v213_v13 = vld [vmem:[%s998_s1] sm:$0x3]  ;;  %584 = vmatprep.mubr.msk.f32.mxu1 %vm754_vm1, %v753_v12  ;;  %587 = vmatprep.subr.bf16.mxu1 %v755_v16  ;;  %v219_v22 = vand.u32 127, %v218_v21  ;;  %v221_v23 = vshrl.u32 %v218_v21, 7 }
  0x3b   : > { %v911_v9 = vld [vmem:[%s166_s11 + $0x38] sm:$0xff]  ;;  %198 = vadd.xlane.f32.xlu0 %v197_v3  ;;  %v200_v10 = vadd.f32 %v905_v6, %v903_v5  ;;  %572 = vmatpush3.xpose.msk.msra.mxu0 %vm245_vm0, %v213_v13  ;;  %v322_v14 = vld [vmem:[%s999_s2] sm:$0xff]  ;;  %v323_v15 = vld [vmem:[%s999_s2 + $0x8] sm:$0xff]  ;;  %vm236_vm5 = vcmask 195712   ;;  %vm243_vm6 = vcmask 261312   ;;  %s188_s27 = scalar_lea.vmem [#allocation5], %s547_s9 }
  0x3c   : > { %204 = vadd.xlane.f32.xlu1 %v203_v7  ;;  %v206_v11 = vadd.f32 %v911_v9, %v909_v8  ;;  %v588_v17 = vpack.c.bf16 %v323_v15, %v322_v14  ;;  %vm589_vm3 = vmpackc.low %vm326_vm2, %vm326_vm2  ;;  %v324_v18 = vld [vmem:[%s999_s2 + $0x10] sm:$0xff]  ;;  %v325_v19 = vld [vmem:[%s999_s2 + $0x18] sm:$0xff]  ;;  %v224_v24 = vadd.s32 4294967288, %v219_v22  ;;  %v231_v26 = vadd.s32 4294967280, %v219_v22  ;;  %s467_s28 = sshll.u32 %s188_s27, 4  ;;  %s563_s29 = sshll.u32 %s800_s16, 10  ;;  %s946_s28 = int_to_ptr.vmem [resolvable:$true] %s467_s28 }
  0x3d   : > { %v592_v20 = vpack.c.bf16 %v325_v19, %v324_v18  ;;  %v238_v27 = vadd.s32 4294967272, %v219_v22  ;;  %v222_v29 = vsub.s32 %v219_v22, %v221_v23  ;;  %v420_v54 = vsub.s32 0, %v221_v23  ;;  %s951_s10 = scalar_lea.hbm %s1000_s3, %s563_s29  ;;  %s454_s16 = scalar_lea.sflag [#allocation4], %s883_s5 }
  0x3e   : > { %590 = vmatpush3.bf16.xpose.msk.msra.mxu1 %vm589_vm3, %v588_v17  ;;  %v227_v31 = vsub.s32 %v224_v24, %v221_v23  ;;  %v234_v32 = vsub.s32 %v231_v26, %v221_v23  ;;  %s682_s11 = scalar_lea.vmem %s946_s28, 1024  ;;  %p1007_p11 = scmp.ne.s32.totalorder %s1004_s24, 0 }
  0x3f   : > { %201 = vadd.xlane.f32.xlu0 %v200_v10  ;;  %591 = vmatprep.subr.bf16.mxu1 %v755_v16  ;;  %v241_v35 = vsub.s32 %v238_v27, %v221_v23  ;;  %p683_p6 = scmp.ne.s32.totalorder %s946_s28, %s682_s11  ;;  %s756_s23 = smov [#allocation5]  }
  0x40   : > { %207 = vadd.xlane.f32.xlu1 %v206_v11  ;;  %s686_s4 = sshll.u32 %s756_s23, 4  ;;  %s687_s4 = int_to_ptr.vmem [resolvable:$false] %s686_s4 }
  0x41   : > { %p684_p12 = pnand %p683_p6, %p1007_p11  ;;  %s688_s6 = scalar_lea.vmem %s687_s4, 2048 }
  0x42   : > { %p689_p8 = scmp.lt.s32.totalorder %s946_s28, %s687_s4  ;;  %p690_p10 = scmp.lt.s32.totalorder %s688_s6, %s682_s11 }
  0x43   : > { %p685_p13 = pneg %p684_p12 }
  0x44   : > { %p691_p0 = por %p690_p10, %p689_p8 }
  0x46   : > { %594 = vmatpush3.bf16.xpose.msk.msra.mxu1 %vm589_vm3, %v592_v20  ;;  %p692_p2 = pnand %p691_p0, %p685_p13 }
  0xc8   : > { %v199_v25 = vpop.xlane.xlu0 %198 }
  0xc9   : > { %v205_v28 = vpop.xlane.xlu1 %204  ;;  %v209_v30 = vmul.f32 0.00390625, %v199_v25 }
  0xca   : > { %v211_v33 = vmul.f32 0.00390625, %v205_v28 }
  0xcb   : > { %v223_v39 = vrot.slane %v209_v30, %v222_v29 }
  0xcc   : > { %v202_v34 = vpop.xlane.xlu0 %201  ;;  %v235_v41 = vrot.slane %v211_v33, %v234_v32 }
  0xcd   : > { %v210_v36 = vmul.f32 0.00390625, %v202_v34  ;;  %v208_v37 = vpop.xlane.xlu1 %207 }
  0xce   : > { %v212_v38 = vmul.f32 0.00390625, %v208_v37 }
  0xcf   : > { %v228_v40 = vrot.slane %v210_v36, %v227_v31 }
  0xd0   : > { %v242_v42 = vrot.slane %v212_v38, %v241_v35 }
  0xd1   : > { %v230_v43 = vsel %vm229_vm4, %v228_v40, %v223_v39 }
  0xd2   : > { %v237_v44 = vsel %vm236_vm5, %v235_v41, %v230_v43 }
  0xd3   : > { %v244_v45 = vsel %vm243_vm6, %v242_v42, %v237_v44 }
  0xd4   : > { %574 = vmatmul.mubr.msk.f32.vlgmr.msra.gmra.mrb[0].mxu0 %vm245_vm0, %v244_v45 }
 0x1a7   : > { %v317_v46 = vpop.f32.mrb[0].mxu0 }
 0x1a8   : > { %v321_v47 = vmax.f32 %v317_v46, 0.0  ;;  %v575_v48 = vpop.f32.mrb[1].mxu0 }
 0x1aa   : > { %585 = vmatmul.mubr.msk.f32.vlgmr.msra.gmra.mrb[0].mxu1 %vm326_vm2, %v321_v47 }
 0x27d   : > { %v408_v49 = vpop.f32.mrb[0].mxu1 }
 0x27e   : > { %v556_v50 = vmul.f32 -1.442695, %v408_v49  ;;  %v586_v51 = vpop.f32.mrb[1].mxu1 }
 0x280   : > { %648 = vpow2.f32 %v556_v50 }
 0x28a   : > { %v649_v52 = vpop.eup %648 }
 0x28b   : > { %v415_v53 = vadd.f32 1.0, %v649_v52 }
 0x28d   : > { %650 = vrcp.f32 %v415_v53 }
 0x297   : > { %v651_v55 = vpop.eup %650 }
 0x298   : > { %v421_v56 = vrot.slane %v651_v55, %v420_v54 }
 0x29a   : > { %427 = vbcast.lane.b32.xlu1 %v421_v56, 264  ;;  %423 = vbcast.lane.b32.xlu0 %v421_v56, 256 }
 0x29e   : > { %431 = vbcast.lane.b32.xlu1 %v421_v56, 272 }
 0x2a2   : > { %435 = vbcast.lane.b32.xlu1 %v421_v56, 280 }
 0x30c   : > { %v428_v57 = vpop.permute.xlu1 %427  ;;  %v424_v58 = vpop.permute.xlu0 %423 }
 0x30d   : > { %v439_v59 = vmul.f32 %v428_v57, %v903_v5  ;;  %v440_v60 = vmul.f32 %v428_v57, %v905_v6  ;;  %v437_v61 = vmul.f32 %v424_v58, %v893_v0  ;;  %v438_v62 = vmul.f32 %v424_v58, %v895_v1 }
 0x30f   : > { %447 = vst [vmem:[%s188_s27 + $0x10] sm:$0xff] %v439_v59  ;;  %448 = vst [vmem:[%s188_s27 + $0x18] sm:$0xff] %v440_v60 }
 0x310   : > { %445 = vst [vmem:[%s188_s27] sm:$0xff] %v437_v61  ;;  %446 = vst [vmem:[%s188_s27 + $0x8] sm:$0xff] %v438_v62  ;;  %v432_v63 = vpop.permute.xlu1 %431 }
 0x311   : > { %v441_v3 = vmul.f32 %v432_v63, %v897_v2  ;;  %v442_v5 = vmul.f32 %v432_v63, %v901_v4 }
 0x313   : > { %449 = vst [vmem:[%s188_s27 + $0x20] sm:$0xff] %v441_v3  ;;  %450 = vst [vmem:[%s188_s27 + $0x28] sm:$0xff] %v442_v5 }
 0x314   : > { %v436_v0 = vpop.permute.xlu1 %435 }
 0x315   : > { %v443_v1 = vmul.f32 %v436_v0, %v909_v8  ;;  %v444_v2 = vmul.f32 %v436_v0, %v911_v9 }
 0x317   : > { %451 = vst [vmem:[%s188_s27 + $0x30] sm:$0xff] %v443_v1  ;;  %452 = vst [vmem:[%s188_s27 + $0x38] sm:$0xff] %v444_v2 }
 0x318   : > { %695 = shalt.err (!%p692_p2)
}
 0x319   : > { %s696_s7 = scalar_lea.hbm %s951_s10, 1024  ;;  %s700_s19 = scalar_lea.hbm %s1000_s3, 2048 }
 0x31a   : > { %p697_p4 = scmp.ne.s32.totalorder %s951_s10, %s696_s7  ;;  %p701_p9 = scmp.lt.u32.totalorder %s951_s10, %s1000_s3 }
 0x31b   : > { %p702_p1 = scmp.lt.u32.totalorder %s700_s19, %s696_s7  ;;  %p704_p6 = scmp.lt.u32.totalorder %s696_s7, %s951_s10 }
 0x31c   : > { %p698_p5 = pnand %p697_p4, %p1007_p11 }
 0x31d   : > { %p703_p3 = por %p702_p1, %p701_p9 }
 0x31e   : > { %p699_p7 = pneg %p698_p5 }
 0x31f   : > { %p705_p12 = por %p704_p6, %p703_p3 }
 0x321   : > { %p706_p13 = pnand %p705_p12, %p699_p7 }
 0x323   : > { %709 = shalt.err (!%p706_p13)
}
 0x324   : > { %s757_s26 = smov 256   ;;  %s758_s27 = smov 16  }
 0x325   : > { %597 = dma.vmem_to_hbm [thread:$0]  (%p1007_p11), %s946_s28, 1024, %s951_s10, %s454_s16, %s757_s26, %s757_s26, %s758_s27  }
 0x326 PF: > { %s482_s29 = sand.u32 1, %s736_s12   ;;  %p1008_p8 = scmp.ne.s32.totalorder %s1005_s25, 0 }
 0x327   : > { %p1009_p10 = scmp.ge.s32.totalorder %s748_s15, 2  ;;  %s483_s30 = scalar_lea.sflag [#allocation4], %s482_s29 }
 0x329   : > { %p604_p0 = pnand %p1009_p10, %p1008_p8 }
 0x32b   : > { %731 = dma.done.wait (!%p604_p0), %s483_s30, 1024  }
 0x32c   : > { %733 = vsyncadd (!%p604_p0), %s483_s30, 4294966272  ;;  %p16_p2 = scmp.ge.s32.totalorder %s804_s18, 4   ;;  %s1010_s12 = smov %s740_s13 }
 0x32d   : > { %s1011_s13 = smov %s744_s14  ;;  %s1012_s14 = smov %s816_s21 }
 0x32e   : > { %s1013_s15 = smov %s804_s18  ;;  %18 = sbr.rel (!%p16_p2) target bundleno = 5 (0x5), region = 77 }
 0x335   :  { %488 = vsyncpa [#allocation3], 1 }
 0x336   :  { %490 = vsyncpa [#allocation3 + $0x1], 1 }
 0x337   :  { %491 = vsyncpa [#allocation4], 1 }
 0x338   :  { %493 = vsyncpa [#allocation4 + $0x1], 1 }

</bundles_post_ra>
